<compile_context>
chip_gen: v7x
topology: tpu7x:2x2x1
jax: 0.10.0
libtpu: 0.0.40
codegen_flags: <defaults>
</compile_context>

<pallas_src>
import functools

import jax
import jax.numpy as jnp
from jax import lax
from jax.experimental import pallas as pl
from jax.experimental.pallas import tpu as pltpu

LANE = 128
SUBLANE = 8


def _round_up(x, m):
    return (x + m - 1) // m * m


def _pad2d(x, rows, cols, dtype):
    x = x.astype(dtype)
    r, c = x.shape
    if r == rows and c == cols:
        return x
    return jnp.zeros((rows, cols), dtype).at[:r, :c].set(x)


def _vmem_limit_bytes(tm, n_pad, fk, hid, c_pad):
    """Rough per-call VMEM budget: double-buffered A row tile + resident operands."""
    need = (
        2 * tm * n_pad * 2                # A row tile, 2 buffers, bf16
        + n_pad * max(fk, c_pad) * 2      # resident feature / HW2 matrix, bf16
        + fk * hid * 2 + hid * c_pad * 2  # resident weights, bf16
        + 2 * tm * c_pad * 4              # output tile, 2 buffers, f32 worst case
        + (4 << 20)                       # slack
    )
    # Clamp to something valid on every generation (v7x physical VMEM = 64 MiB).
    return int(min(max(need, 16 << 20), 64 << 20))


# --------------------------- shared helpers ---------------------------

def _hidden_to_hw2(h_f32, b1, w2):
    """ReLU(h + b1) @ W2 with f32 accumulation."""
    h = jnp.maximum(h_f32 + b1, 0.0)
    return jnp.dot(h.astype(jnp.bfloat16), w2, preferred_element_type=jnp.float32)


def _log_softmax_rows(z, num_classes):
    """Row-wise log-softmax, masking padded class lanes (done in f32)."""
    if num_classes < z.shape[1]:
        col = lax.broadcasted_iota(jnp.int32, z.shape, 1)
        z = jnp.where(col < num_classes, z, -jnp.inf)
    m = jnp.max(z, axis=1, keepdims=True)
    s = z - m
    lse = jnp.log(jnp.sum(jnp.exp(s), axis=1, keepdims=True))
    return s - lse


# --------------------------- tiled kernels -----------------------------

def _layer1_narrow_kernel(a_ref, x_ref, w1_ref, b1_ref, w2_ref, hw2_ref):
    # F_in <= H: aggregate over the narrow feature axis first: (A @ X) @ W1.
    ax = jnp.dot(a_ref[...], x_ref[...], preferred_element_type=jnp.float32)
    h = jnp.dot(ax.astype(jnp.bfloat16), w1_ref[...],
                preferred_element_type=jnp.float32)
    hw2_ref[...] = _hidden_to_hw2(h, b1_ref[...], w2_ref[...]).astype(hw2_ref.dtype)


def _layer1_wide_kernel(a_ref, xw1_ref, b1_ref, w2_ref, hw2_ref):
    # F_in > H: X @ W1 was precomputed once in the wrapper; aggregate over H.
    h = jnp.dot(a_ref[...], xw1_ref[...], preferred_element_type=jnp.float32)
    hw2_ref[...] = _hidden_to_hw2(h, b1_ref[...], w2_ref[...]).astype(hw2_ref.dtype)


def _layer2_kernel(a_ref, hw2_ref, b2_ref, o_ref, *, num_classes):
    z = jnp.dot(a_ref[...], hw2_ref[...], preferred_element_type=jnp.float32)
    o_ref[...] = _log_softmax_rows(z + b2_ref[...], num_classes)


# --------------------------- fused kernels (single tile) ---------------

def _fused_narrow_kernel(a_ref, x_ref, w1_ref, b1_ref, w2_ref, b2_ref, o_ref,
                         *, num_classes):
    ax = jnp.dot(a_ref[...], x_ref[...], preferred_element_type=jnp.float32)
    h = jnp.dot(ax.astype(jnp.bfloat16), w1_ref[...],
                preferred_element_type=jnp.float32)
    hw2 = _hidden_to_hw2(h, b1_ref[...], w2_ref[...])
    z = jnp.dot(a_ref[...], hw2.astype(jnp.bfloat16),
                preferred_element_type=jnp.float32)
    o_ref[...] = _log_softmax_rows(z + b2_ref[...], num_classes)


def _fused_wide_kernel(a_ref, xw1_ref, b1_ref, w2_ref, b2_ref, o_ref,
                       *, num_classes):
    h = jnp.dot(a_ref[...], xw1_ref[...], preferred_element_type=jnp.float32)
    hw2 = _hidden_to_hw2(h, b1_ref[...], w2_ref[...])
    z = jnp.dot(a_ref[...], hw2.astype(jnp.bfloat16),
                preferred_element_type=jnp.float32)
    o_ref[...] = _log_softmax_rows(z + b2_ref[...], num_classes)


# ------------------------------ wrapper --------------------------------

def gcn_forward(a_norm, x, w1, b1, w2, b2, *, tile_rows=512):
    n, f_in = x.shape
    hid = w1.shape[1]
    c = w2.shape[1]
    c_pad = _round_up(c, LANE)

    # Node-row tiling: one tile when small, tile_rows-row tiles when large.
    tm = min(tile_rows, _round_up(n, SUBLANE))
    n_pad = _round_up(n, tm)
    num_tiles = n_pad // tm

    # --- pad + cast (bf16 matmul inputs, f32 biases) ---
    a_bf = _pad2d(a_norm, n_pad, n_pad, jnp.bfloat16)
    w2_pad = _pad2d(w2, hid, c_pad, jnp.bfloat16)
    b1_f = _pad2d(b1.reshape(1, hid), 1, hid, jnp.float32)
    b2_pad = _pad2d(b2.reshape(1, c), 1, c_pad, jnp.float32)

    narrow = f_in <= hid
    if narrow:
        feat = _pad2d(x, n_pad, f_in, jnp.bfloat16)
        fk = f_in
    else:
        # Cheap O(N*F*H) projection done once; the N^2 aggregation then runs over H.
        xw1 = jnp.dot(x.astype(jnp.bfloat16), w1.astype(jnp.bfloat16),
                      preferred_element_type=jnp.float32).astype(jnp.bfloat16)
        feat = _pad2d(xw1, n_pad, hid, jnp.bfloat16)
        fk = hid

    def resident(shape):
        return pl.BlockSpec(shape, lambda i, _s=shape: tuple(0 for _ in _s))

    compiler_params = pltpu.CompilerParams(
        dimension_semantics=("parallel",),
        vmem_limit_bytes=_vmem_limit_bytes(tm, n_pad, fk, hid, c_pad),
    )

    n2_flops = 2 * n_pad * n_pad * fk + 2 * n_pad * n_pad * c_pad
    proj_flops = (2 * n_pad * fk * hid if narrow else 0) + 2 * n_pad * hid * c_pad

    # ---- fused path: whole graph fits in one node-row tile ----
    if num_tiles == 1:
        if narrow:
            kernel = functools.partial(_fused_narrow_kernel, num_classes=c)
            inputs = (a_bf, feat, w1.astype(jnp.bfloat16), b1_f, w2_pad, b2_pad)
            specs = [resident((n_pad, n_pad)), resident((n_pad, fk)),
                     resident((f_in, hid)), resident((1, hid)),
                     resident((hid, c_pad)), resident((1, c_pad))]
        else:
            kernel = functools.partial(_fused_wide_kernel, num_classes=c)
            inputs = (a_bf, feat, b1_f, w2_pad, b2_pad)
            specs = [resident((n_pad, n_pad)), resident((n_pad, fk)),
                     resident((1, hid)), resident((hid, c_pad)),
                     resident((1, c_pad))]

        out_pad = pl.pallas_call(
            kernel,
            out_shape=jax.ShapeDtypeStruct((n_pad, c_pad), jnp.float32),
            grid=(1,),
            in_specs=specs,
            out_specs=resident((n_pad, c_pad)),
            compiler_params=compiler_params,
            cost_estimate=pl.CostEstimate(
                flops=n2_flops + proj_flops,
                transcendentals=n_pad * c_pad,
                bytes_accessed=a_bf.size * 2 + feat.size * 2 + n_pad * c_pad * 4),
        )(*inputs)
        return out_pad[:n, :c]

    # ---- tiled path: two row-tiled passes ----
    row_spec = pl.BlockSpec((tm, n_pad), lambda i: (i, 0))

    if narrow:
        l1_kernel = _layer1_narrow_kernel
        l1_inputs = (a_bf, feat, w1.astype(jnp.bfloat16), b1_f, w2_pad)
        l1_specs = [row_spec, resident((n_pad, fk)), resident((f_in, hid)),
                    resident((1, hid)), resident((hid, c_pad))]
    else:
        l1_kernel = _layer1_wide_kernel
        l1_inputs = (a_bf, feat, b1_f, w2_pad)
        l1_specs = [row_spec, resident((n_pad, fk)), resident((1, hid)),
                    resident((hid, c_pad))]

    hw2 = pl.pallas_call(
        l1_kernel,
        out_shape=jax.ShapeDtypeStruct((n_pad, c_pad), jnp.bfloat16),
        grid=(num_tiles,),
        in_specs=l1_specs,
        out_specs=pl.BlockSpec((tm, c_pad), lambda i: (i, 0)),
        compiler_params=compiler_params,
        cost_estimate=pl.CostEstimate(
            flops=2 * n_pad * n_pad * fk + proj_flops,
            transcendentals=0,
            bytes_accessed=a_bf.size * 2 + feat.size * 2 + n_pad * c_pad * 2),
    )(*l1_inputs)

    out_pad = pl.pallas_call(
        functools.partial(_layer2_kernel, num_classes=c),
        out_shape=jax.ShapeDtypeStruct((n_pad, c_pad), jnp.float32),
        grid=(num_tiles,),
        in_specs=[row_spec, resident((n_pad, c_pad)), resident((1, c_pad))],
        out_specs=pl.BlockSpec((tm, c_pad), lambda i: (i, 0)),
        compiler_params=compiler_params,
        cost_estimate=pl.CostEstimate(
            flops=2 * n_pad * n_pad * c_pad,
            transcendentals=n_pad * c_pad,
            bytes_accessed=a_bf.size * 2 + n_pad * c_pad * 2 + n_pad * c_pad * 4),
    )(a_bf, hw2, b2_pad)

    return out_pad[:n, :c]


def build_normalized_adjacency(edge_index, num_nodes):
    """Dense D^-1/2 (A + I) D^-1/2, matching PyG GCNConv(add_self_loops=True)."""
    src, dst = edge_index[0], edge_index[1]
    a = jnp.zeros((num_nodes, num_nodes), jnp.float32)
    a = a.at[dst, src].add(1.0)          # aggregate messages src -> dst
    a = a + jnp.eye(num_nodes, dtype=jnp.float32)
    deg = jnp.sum(a, axis=1)
    d_inv_sqrt = jnp.where(deg > 0, 1.0 / jnp.sqrt(deg), 0.0)
    return d_inv_sqrt[:, None] * a * d_inv_sqrt[None, :]


def gcn_reference(a_norm, x, w1, b1, w2, b2):
    h = jnp.maximum(a_norm @ (x @ w1) + b1, 0.0)
    z = a_norm @ (h @ w2) + b2
    return jax.nn.log_softmax(z, axis=1)


if __name__ == "__main__":
    key = jax.random.PRNGKey(0)
    num_nodes = 8
    input_dim = 16
    hidden_dim = 32
    output_dim = 8

    k_x, k_e, k_w1, k_w2 = jax.random.split(key, 4)

    # Node features
    x = jax.random.normal(k_x, (num_nodes, input_dim), dtype=jnp.float32)

    # Deterministic small edge list (src, dst)
    num_edges = 16
    src = jax.random.randint(k_e, (num_edges,), 0, num_nodes)
    dst = (src + 1 + jnp.arange(num_edges) % (num_nodes - 1)) % num_nodes
    edge_index = jnp.stack([src, dst], axis=0).astype(jnp.int32)

    # Deterministic parameter init (glorot-uniform-like), stored as [in, out]
    def glorot(k, fan_in, fan_out):
        limit = (6.0 / (fan_in + fan_out)) ** 0.5
        return jax.random.uniform(k, (fan_in, fan_out), jnp.float32, -limit, limit)

    w1 = glorot(k_w1, input_dim, hidden_dim)
    b1 = jnp.zeros((1, hidden_dim), jnp.float32)
    w2 = glorot(k_w2, hidden_dim, output_dim)
    b2 = jnp.zeros((1, output_dim), jnp.float32)

    a_norm = build_normalized_adjacency(edge_index, num_nodes)

    out = gcn_forward(a_norm, x, w1, b1, w2, b2)
    out = jax.block_until_ready(out)

    # sanity: shape, log_softmax rows sum to 1 in prob space, matches f32 reference
    assert out.shape == (num_nodes, output_dim)
    row_sums = jnp.sum(jnp.exp(out), axis=1)
    assert bool(jnp.all(jnp.abs(row_sums - 1.0) < 1e-3))

    ref = gcn_reference(a_norm, x, w1, b1, w2, b2)
    assert bool(jnp.max(jnp.abs(out - ref)) < 0.25)   # bf16 matmul tolerance

    print("KERNEL_OK")
</pallas_src>

<mosaic_0001>
module attributes {stable_mosaic.version = 11 : i64} {
  func.func @_fused_narrow_kernel(%arg0: i32, %arg1: memref<8x8xbf16, #tpu.memory_space<vmem>>, %arg2: memref<8x16xbf16, #tpu.memory_space<vmem>>, %arg3: memref<16x32xbf16, #tpu.memory_space<vmem>>, %arg4: memref<1x32xf32, #tpu.memory_space<vmem>>, %arg5: memref<32x128xbf16, #tpu.memory_space<vmem>>, %arg6: memref<1x128xf32, #tpu.memory_space<vmem>>, %arg7: memref<8x128xf32, #tpu.memory_space<vmem>>) attributes {dimension_semantics = [#tpu.dimension_semantics<parallel>], iteration_bounds = array<i64: 1>, scalar_prefetch = 0 : i64, scratch_operands = 0 : i64, tpu.core_type = #tpu.core_type<tc>, window_params = [{pipeline_mode = #tpu.pipeline_mode<synchronous>, transform_indices = @transform_0, window_bounds = array<i64: 8, 8>}, {pipeline_mode = #tpu.pipeline_mode<synchronous>, transform_indices = @transform_1, window_bounds = array<i64: 8, 16>}, {pipeline_mode = #tpu.pipeline_mode<synchronous>, transform_indices = @transform_2, window_bounds = array<i64: 16, 32>}, {pipeline_mode = #tpu.pipeline_mode<synchronous>, transform_indices = @transform_3, window_bounds = array<i64: 1, 32>}, {pipeline_mode = #tpu.pipeline_mode<synchronous>, transform_indices = @transform_4, window_bounds = array<i64: 32, 128>}, {pipeline_mode = #tpu.pipeline_mode<synchronous>, transform_indices = @transform_5, window_bounds = array<i64: 1, 128>}, {pipeline_mode = #tpu.pipeline_mode<synchronous>, transform_indices = @transform_6, window_bounds = array<i64: 8, 128>}]} {
    %c0 = arith.constant 0 : index
    %c0_0 = arith.constant 0 : index
    %0 = vector.load %arg1[%c0, %c0_0] : memref<8x8xbf16, #tpu.memory_space<vmem>>, vector<8x8xbf16>
    %c0_1 = arith.constant 0 : index
    %c0_2 = arith.constant 0 : index
    %1 = vector.load %arg2[%c0_1, %c0_2] : memref<8x16xbf16, #tpu.memory_space<vmem>>, vector<8x16xbf16>
    %cst = arith.constant dense<0.000000e+00> : vector<8x16xf32>
    %2 = tpu.matmul %0, %1, %cst {dimension_numbers = #tpu.dot_dimension_numbers<[1], [0], [0], [1], [0, 0, 1, 1], [], []>} : vector<8x8xbf16>, vector<8x16xbf16>, vector<8x16xf32> -> vector<8x16xf32>
    %3 = arith.truncf %2 : vector<8x16xf32> to vector<8x16xbf16>
    %c0_3 = arith.constant 0 : index
    %c0_4 = arith.constant 0 : index
    %4 = vector.load %arg3[%c0_3, %c0_4] : memref<16x32xbf16, #tpu.memory_space<vmem>>, vector<16x32xbf16>
    %cst_5 = arith.constant dense<0.000000e+00> : vector<8x32xf32>
    %5 = tpu.matmul %3, %4, %cst_5 {dimension_numbers = #tpu.dot_dimension_numbers<[1], [0], [0], [1], [0, 0, 1, 1], [], []>} : vector<8x16xbf16>, vector<16x32xbf16>, vector<8x32xf32> -> vector<8x32xf32>
    %c0_6 = arith.constant 0 : index
    %c0_7 = arith.constant 0 : index
    %6 = vector.load %arg4[%c0_6, %c0_7] : memref<1x32xf32, #tpu.memory_space<vmem>>, vector<1x32xf32>
    %c0_8 = arith.constant 0 : index
    %c0_9 = arith.constant 0 : index
    %7 = vector.load %arg5[%c0_8, %c0_9] : memref<32x128xbf16, #tpu.memory_space<vmem>>, vector<32x128xbf16>
    %8 = vector.broadcast %6 : vector<1x32xf32> to vector<8x32xf32>
    %9 = arith.addf %5, %8 : vector<8x32xf32>
    %cst_10 = arith.constant 0.000000e+00 : f32
    %10 = vector.broadcast %cst_10 : f32 to vector<8x32xf32>
    %11 = arith.maximumf %9, %10 : vector<8x32xf32>
    %12 = arith.truncf %11 : vector<8x32xf32> to vector<8x32xbf16>
    %cst_11 = arith.constant dense<0.000000e+00> : vector<8x128xf32>
    %13 = tpu.matmul %12, %7, %cst_11 {dimension_numbers = #tpu.dot_dimension_numbers<[1], [0], [0], [1], [0, 0, 1, 1], [], []>} : vector<8x32xbf16>, vector<32x128xbf16>, vector<8x128xf32> -> vector<8x128xf32>
    %c0_12 = arith.constant 0 : index
    %c0_13 = arith.constant 0 : index
    %14 = vector.load %arg1[%c0_12, %c0_13] : memref<8x8xbf16, #tpu.memory_space<vmem>>, vector<8x8xbf16>
    %15 = arith.truncf %13 : vector<8x128xf32> to vector<8x128xbf16>
    %cst_14 = arith.constant dense<0.000000e+00> : vector<8x128xf32>
    %16 = tpu.matmul %14, %15, %cst_14 {dimension_numbers = #tpu.dot_dimension_numbers<[1], [0], [0], [1], [0, 0, 1, 1], [], []>} : vector<8x8xbf16>, vector<8x128xbf16>, vector<8x128xf32> -> vector<8x128xf32>
    %c0_15 = arith.constant 0 : index
    %c0_16 = arith.constant 0 : index
    %17 = vector.load %arg6[%c0_15, %c0_16] : memref<1x128xf32, #tpu.memory_space<vmem>>, vector<1x128xf32>
    %18 = vector.broadcast %17 : vector<1x128xf32> to vector<8x128xf32>
    %19 = arith.addf %16, %18 : vector<8x128xf32>
    %20 = tpu.iota {dimensions = array<i32: 1>} : vector<8x128xi32>
    %c8_i32 = arith.constant 8 : i32
    %21 = vector.broadcast %c8_i32 : i32 to vector<8x128xi32>
    %22 = arith.cmpi slt, %20, %21 : vector<8x128xi32>
    %cst_17 = arith.constant 0xFF800000 : f32
    %23 = vector.broadcast %cst_17 : f32 to vector<8x128xf32>
    %24 = arith.select %22, %19, %23 : vector<8x128xi1>, vector<8x128xf32>
    %cst_18 = arith.constant dense<0xFF800000> : vector<8xf32>
    %25 = vector.multi_reduction <maximumf>, %24, %cst_18 [1] : vector<8x128xf32> to vector<8xf32>
    %26 = vector.shape_cast %25 : vector<8xf32> to vector<8x1xf32>
    %27 = vector.broadcast %26 : vector<8x1xf32> to vector<8x128xf32>
    %28 = arith.subf %24, %27 : vector<8x128xf32>
    %29 = math.exp %28 : vector<8x128xf32>
    %cst_19 = arith.constant dense<0.000000e+00> : vector<8xf32>
    %30 = vector.multi_reduction <add>, %29, %cst_19 [1] : vector<8x128xf32> to vector<8xf32>
    %31 = vector.shape_cast %30 : vector<8xf32> to vector<8x1xf32>
    %32 = math.log %31 : vector<8x1xf32>
    %33 = vector.broadcast %32 : vector<8x1xf32> to vector<8x128xf32>
    %34 = arith.subf %28, %33 : vector<8x128xf32>
    %c0_20 = arith.constant 0 : index
    %c0_21 = arith.constant 0 : index
    %35 = vector.load %arg7[%c0_20, %c0_21] : memref<8x128xf32, #tpu.memory_space<vmem>>, vector<8x128xf32>
    tpu.vector_store %arg7[%c0_20, %c0_21], %34 {strides = array<i32>} : memref<8x128xf32, #tpu.memory_space<vmem>>, vector<8x128xf32>,
    return
  }
  func.func @transform_0(%arg0: i32) -> (i32, i32) {
    %c0_i32 = arith.constant 0 : i32
    %c0_i32_0 = arith.constant 0 : i32
    %c0_i32_1 = arith.constant 0 : i32
    return %c0_i32, %c0_i32_0 : i32, i32
  }
  func.func @transform_1(%arg0: i32) -> (i32, i32) {
    %c0_i32 = arith.constant 0 : i32
    %c0_i32_0 = arith.constant 0 : i32
    %c0_i32_1 = arith.constant 0 : i32
    return %c0_i32, %c0_i32_0 : i32, i32
  }
  func.func @transform_2(%arg0: i32) -> (i32, i32) {
    %c0_i32 = arith.constant 0 : i32
    %c0_i32_0 = arith.constant 0 : i32
    %c0_i32_1 = arith.constant 0 : i32
    return %c0_i32, %c0_i32_0 : i32, i32
  }
  func.func @transform_3(%arg0: i32) -> (i32, i32) {
    %c0_i32 = arith.constant 0 : i32
    %c0_i32_0 = arith.constant 0 : i32
    %c0_i32_1 = arith.constant 0 : i32
    return %c0_i32, %c0_i32_0 : i32, i32
  }
  func.func @transform_4(%arg0: i32) -> (i32, i32) {
    %c0_i32 = arith.constant 0 : i32
    %c0_i32_0 = arith.constant 0 : i32
    %c0_i32_1 = arith.constant 0 : i32
    return %c0_i32, %c0_i32_0 : i32, i32
  }
  func.func @transform_5(%arg0: i32) -> (i32, i32) {
    %c0_i32 = arith.constant 0 : i32
    %c0_i32_0 = arith.constant 0 : i32
    %c0_i32_1 = arith.constant 0 : i32
    return %c0_i32, %c0_i32_0 : i32, i32
  }
  func.func @transform_6(%arg0: i32) -> (i32, i32) {
    %c0_i32 = arith.constant 0 : i32
    %c0_i32_0 = arith.constant 0 : i32
    %c0_i32_1 = arith.constant 0 : i32
    return %c0_i32, %c0_i32_0 : i32, i32
  }
}

</mosaic_0001>

<bundles_post_ra>
// kernel: tpu_custom_call.1
= control target key start
LH: loop header
LB: loop body
LE: loop exit
PB: predicated region body
PF: predicated region fallthrough
CT: control target
= control target key end

     0   :  { %11 = vsyncpa [#allocation3], 0  ;;  %s627_s0 = inlined_call_operand.hbm [shape: bf16[8,8], index: 0, kind: input, shape index: {}]   ;;  %s628_s1 = inlined_call_operand.hbm [shape: bf16[8,16], index: 1, kind: input, shape index: {}]   ;;  %s629_s2 = inlined_call_operand.hbm [shape: bf16[16,32], index: 2, kind: input, shape index: {}]   ;;  %s630_s3 = inlined_call_operand.vmem [shape: f32[1,32], index: 3, kind: input, shape index: {}]   ;;  %s631_s4 = inlined_call_operand.hbm [shape: bf16[32,128], index: 4, kind: input, shape index: {}]   ;;  %s632_s5 = inlined_call_operand.vmem [shape: f32[1,128], index: 5, kind: input, shape index: {}]   ;;  %s633_s6 = inlined_call_operand.hbm [shape: f32[8,128], index: 6, kind: output, shape index: {}]  }
   0x1   :  { %12 = vsyncpa [#allocation6], 0 }
   0x2   :  { %13 = vsyncpa [#allocation9], 0 }
   0x3   :  { %14 = vsyncpa [#allocation4], 0  ;;  %s509_s21 = smov [#allocation5]   ;;  %s510_s23 = smov [#allocation2]  }
   0x4   :  { %s31_s22 = sshll.u32 %s509_s21, 4  ;;  %s21_s24 = sshll.u32 %s510_s23, 4  ;;  %s32_s22 = int_to_ptr.vmem [resolvable:$true] %s31_s22  ;;  %s22_s24 = int_to_ptr.vmem [resolvable:$true] %s21_s24 }
   0x5   :  { %s391_s27 = scalar_lea.hbm %s628_s1, 64 }
   0x6   :  { %p392_p0 = scmp.ne.s32.totalorder %s628_s1, %s391_s27  ;;  %p395_p1 = scmp.lt.u32.totalorder %s391_s27, %s628_s1 }
   0x8   :  { %p397_p2 = pnand %p395_p1, %p392_p0 }
   0xa   :  { %400 = shalt.err (!%p397_p2)
}
   0xb   :  { %s401_s8 = scalar_lea.vmem %s32_s22, 64  ;;  %p406_p4 = scmp.lt.s32.totalorder %s32_s22, %s32_s22 }
   0xc   :  { %p402_p3 = scmp.ne.s32.totalorder %s32_s22, %s401_s8  ;;  %p407_p5 = scmp.lt.s32.totalorder %s401_s8, %s401_s8 }
   0xe   :  { %p408_p6 = por %p407_p5, %p406_p4 }
  0x10   :  { %p409_p7 = pnand %p408_p6, %p402_p3 }
  0x12   :  { %412 = shalt.err (!%p409_p7)
}
  0x13   :  { %34 = dma.hbm_to_vmem [thread:$0]  %s628_s1, 64, %s32_s22, [#allocation6]  }
  0x14   :  { %s413_s13 = scalar_lea.hbm %s627_s0, 64 }
  0x15   :  { %p414_p8 = scmp.ne.s32.totalorder %s627_s0, %s413_s13  ;;  %p417_p9 = scmp.lt.u32.totalorder %s413_s13, %s627_s0 }
  0x17   :  { %p419_p10 = pnand %p417_p9, %p414_p8 }
  0x19   :  { %422 = shalt.err (!%p419_p10)
}
  0x1a   :  { %s423_s18 = scalar_lea.vmem %s22_s24, 64  ;;  %p428_p12 = scmp.lt.s32.totalorder %s22_s24, %s22_s24 }
  0x1b   :  { %p424_p11 = scmp.ne.s32.totalorder %s22_s24, %s423_s18  ;;  %p429_p13 = scmp.lt.s32.totalorder %s423_s18, %s423_s18 }
  0x1d   :  { %p430_p0 = por %p429_p13, %p428_p12 }
  0x1f   :  { %p431_p1 = pnand %p430_p0, %p424_p11 }
  0x21   :  { %434 = shalt.err (!%p431_p1)
}
  0x22   :  { %24 = dma.hbm_to_vmem [thread:$0]  %s627_s0, 64, %s22_s24, [#allocation3]  }
  0x23   :  { %s511_s20 = smov [#allocation7]   ;;  %s435_s25 = scalar_lea.hbm %s629_s2, 128 }
  0x24   :  { %s40_s21 = sshll.u32 %s511_s20, 4  ;;  %p436_p2 = scmp.ne.s32.totalorder %s629_s2, %s435_s25  ;;  %s41_s21 = int_to_ptr.vmem [resolvable:$true] %s40_s21 }
  0x25   :  { %p439_p3 = scmp.lt.u32.totalorder %s435_s25, %s629_s2 }
  0x27   :  { %p441_p4 = pnand %p439_p3, %p436_p2 }
  0x29   :  { %444 = shalt.err (!%p441_p4)
}
  0x2a   :  { %s445_s30 = scalar_lea.vmem %s41_s21, 128  ;;  %p450_p6 = scmp.lt.s32.totalorder %s41_s21, %s41_s21 }
  0x2b   :  { %p446_p5 = scmp.ne.s32.totalorder %s41_s21, %s445_s30  ;;  %p451_p7 = scmp.lt.s32.totalorder %s445_s30, %s445_s30 }
  0x2d   :  { %p452_p8 = por %p451_p7, %p450_p6 }
  0x2f   :  { %p453_p9 = pnand %p452_p8, %p446_p5 }
  0x31   :  { %456 = shalt.err (!%p453_p9)
}
  0x32   :  { %s512_s0 = smov 64   ;;  %s513_s24 = smov 4  }
  0x33   :  { %46 = dma.hbm_to_vmem [thread:$0]  %s629_s2, 128, %s41_s21, [#allocation6], %s512_s0, %s512_s0, %s513_s24  }
  0x34   :  { %s514_s9 = smov [#allocation8]   ;;  %s457_s13 = scalar_lea.hbm %s631_s4, 256 }
  0x35   :  { %s54_s10 = sshll.u32 %s514_s9, 4  ;;  %p458_p10 = scmp.ne.s32.totalorder %s631_s4, %s457_s13  ;;  %s55_s10 = int_to_ptr.vmem [resolvable:$true] %s54_s10 }
  0x36   :  { %p461_p11 = scmp.lt.u32.totalorder %s457_s13, %s631_s4 }
  0x38   :  { %p463_p12 = pnand %p461_p11, %p458_p10 }
  0x3a   :  { %466 = shalt.err (!%p463_p12)
}
  0x3b   :  { %s467_s18 = scalar_lea.vmem %s55_s10, 256  ;;  %p472_p0 = scmp.lt.s32.totalorder %s55_s10, %s55_s10 }
  0x3c   :  { %p468_p13 = scmp.ne.s32.totalorder %s55_s10, %s467_s18  ;;  %p473_p1 = scmp.lt.s32.totalorder %s467_s18, %s467_s18 }
  0x3e   :  { %p474_p2 = por %p473_p1, %p472_p0 }
  0x40   :  { %p475_p3 = pnand %p474_p2, %p468_p13 }
  0x42   :  { %478 = shalt.err (!%p475_p3)
}
  0x43   :  { %60 = dma.hbm_to_vmem [thread:$0]  %s631_s4, 256, %s55_s10, [#allocation9], %s512_s0, %s512_s0, %s513_s24  }
  0x44   :  { %501 = dma.done.wait [#allocation3], 64  }
  0x45   :  { %502 = vsyncadd [#allocation3], 4294967232 }
  0x46   :  { %503 = dma.done.wait [#allocation6], 192  }
  0x47   :  { %504 = vsyncadd [#allocation6], 4294967104 }
  0x48   :  { %505 = dma.done.wait [#allocation9], 256  }
  0x49   :  { %506 = vsyncadd [#allocation9], 4294967040  ;;  %v515_v0 = vmov 0.0   ;;  %vm516_vm0 = vmmov 0   ;;  %vm82_vm1 = vcmask 1043456   ;;  %vm78_vm2 = vcmask 64512  }
  0x4a   :  { %349 = vmatprep.subr.bf16.mxu0 %v515_v0  ;;  %351 = vmatprep.mubr.msk.bf16.mxu0 %vm516_vm0, %v515_v0  ;;  %v77_v1 = vld [vmem:[#allocation5] sm:$0xf]  ;;  %v76_v2 = vld [vmem:[#allocation2] sm:$0xf]  ;;  %v384_v4 = vld [vmem:[#allocation7] sm:$0xff]   ;;  %vm146_vm3 = vcmask 130048   ;;  %v299_v26 = vlaneseq }
  0x4b   :  { %355 = vmatprep.subr.bf16.mxu1 %v515_v0  ;;  %357 = vmatprep.mubr.msk.bf16.mxu1 %vm516_vm0, %v515_v0  ;;  %v84_v3 = vsel %vm82_vm1, %v77_v1, 0  ;;  %v385_v10 = vld [vmem:[#allocation8] sm:$0xff]   ;;  %v386_v11 = vld [vmem:[#allocation8 + $0x8] sm:$0xff]   ;;  %v332_v12 = vld [vmem:[%s630_s3] ss:$0 sm:$0xff]  ;;  %vm204_vm4 = vcmask 261120  }
  0x4c   :  { %350 = vmatpush3.bf16.msra.mxu0 %v84_v3  ;;  %356 = vmatpush3.bf16.msra.mxu1 %v384_v4  ;;  %v300_v27 = vand.u32 127, %v299_v26  ;;  %v338_v28 = vld [vmem:[%s632_s5] ss:$0 sm:$0xff]  ;;  %s517_s21 = smov [#allocation10]  }
  0x4d   :  { %361 = vmatprep.subr.bf16.mxu0 %v515_v0  ;;  %369 = vmatprep.subr.bf16.mxu1 %v515_v0  ;;  %s320_s22 = sshll.u32 %s517_s21, 4  ;;  %s321_s22 = int_to_ptr.vmem [resolvable:$true] %s320_s22 }
  0x4e   :  { %vm301_vm5 = vcmp.lt.s32.totalorder %v300_v27, 8  ;;  %s479_s5 = scalar_lea.vmem %s321_s22, 128  ;;  %p484_p5 = scmp.lt.s32.totalorder %s321_s22, %s321_s22 }
  0x4f   :  { %352 = vmatmul.mubr.msk.bf16.vlgmr.msra.gmra.mrb[0].mxu0 %vm78_vm2, %v76_v2  ;;  %p480_p4 = scmp.ne.s32.totalorder %s321_s22, %s479_s5  ;;  %p485_p6 = scmp.lt.s32.totalorder %s479_s5, %s479_s5 }
  0x50   :  { %365 = vmatprep.mubr.msk.bf16.mxu0 %vm516_vm0, %v515_v0  ;;  %362 = vmatpush3.bf16.msra.mxu0 %v385_v10 }
  0x51   :  { %363 = vmatprep.subr.bf16.mxu0 %v515_v0  ;;  %p486_p7 = por %p485_p6, %p484_p5 }
  0x53   :  { %p487_p8 = pnand %p486_p7, %p480_p4 }
  0x54   :  { %364 = vmatpush3.bf16.msra.mxu0 %v386_v11 }
 0x122   :  { %v120_v5 = vpop.f32.mrb[0].mxu0 }
 0x123   :  { %v126_v6 = vpack.c.bf16 %v120_v5, %v120_v5  ;;  %v353_v7 = vpop.f32.mrb[1].mxu0 }
 0x124   :  { %v123_v8 = vpop.f32.mrb[2].mxu0 }
 0x125   :  { %v354_v9 = vpop.f32.mrb[3].mxu0  ;;  %358 = vmatmul.mubr.msk.bf16.vlgmr.msra.gmra.mrb[0].mxu1 %vm146_vm3, %v126_v6 }
 0x126   :  { %371 = vmatprep.mubr.msk.bf16.mxu1 %vm516_vm0, %v515_v0 }
 0x1f8   :  { %v184_v13 = vpop.f32.mrb[0].mxu1 }
 0x1f9   :  { %v185_v14 = vadd.f32 %v332_v12, %v184_v13  ;;  %v359_v15 = vpop.f32.mrb[1].mxu1 }
 0x1fa   :  { %v187_v16 = vpop.f32.mrb[2].mxu1 }
 0x1fb   :  { %v190_v17 = vmax.f32 %v185_v14, 0.0  ;;  %v360_v18 = vpop.f32.mrb[3].mxu1 }
 0x1fd   :  { %v191_v19 = vpack.c.bf16 %v190_v17, %v190_v17 }
 0x1ff   :  { %366 = vmatmul.mubr.msk.bf16.vlgmr.msra.gmra.mrb[4].mxu0 %vm204_vm4, %v191_v19 }
 0x2d2   :  { %v242_v20 = vpop.f32.mrb[4].mxu0 }
 0x2d3   :  { %v248_v21 = vpack.c.bf16 %v242_v20, %v242_v20  ;;  %v367_v22 = vpop.f32.mrb[5].mxu0 }
 0x2d4   :  { %v245_v23 = vpop.f32.mrb[6].mxu0 }
 0x2d5   :  { %v257_v24 = vsel %vm82_vm1, %v248_v21, 0  ;;  %v368_v25 = vpop.f32.mrb[7].mxu0 }
 0x2d6   :  { %370 = vmatpush3.bf16.msra.mxu1 %v257_v24 }
 0x2d9   :  { %372 = vmatmul.mubr.msk.bf16.vlgmr.msra.gmra.mrb[4].mxu1 %vm78_vm2, %v76_v2 }
 0x3ac   :  { %v293_v29 = vpop.f32.mrb[4].mxu1 }
 0x3ad   :  { %v294_v30 = vadd.f32 %v338_v28, %v293_v29  ;;  %v373_v31 = vpop.f32.mrb[5].mxu1 }
 0x3ae   :  { %v296_v32 = vpop.f32.mrb[6].mxu1 }
 0x3af   :  { %v302_v33 = vsel %vm301_vm5, %v294_v30, -inf  ;;  %v374_v34 = vpop.f32.mrb[7].mxu1 }
 0x3b0   :  { %303 = vmax.xlane.f32.xlu0 %v302_v33 }
 0x43d   :  { %v304_v35 = vpop.xlane.xlu0 %303 }
 0x43e   :  { %v305_v36 = vsub.f32 %v302_v33, %v304_v35 }
 0x440   :  { %v306_v37 = vmul.f32 1.442695, %v305_v36 }
 0x442   :  { %387 = vpow2.f32 %v306_v37 }
 0x44c   :  { %v388_v38 = vpop.eup %387 }
 0x44d   :  { %308 = vadd.xlane.f32.xlu0 %v388_v38 }
 0x4da   :  { %v309_v39 = vpop.xlane.xlu0 %308 }
 0x4db   :  { %389 = vlog2.f32 %v309_v39 }
 0x4e5   :  { %v390_v40 = vpop.eup %389 }
 0x4e6   :  { %v311_v41 = vmul.f32 0.6931472, %v390_v40 }
 0x4e8   :  { %v312_v42 = vsub.f32 %v305_v36, %v311_v41 }
 0x4ea   :  { %313 = vst [vmem:[#allocation10] sm:$0xff] %v312_v42 }
 0x4eb   :  { %490 = shalt.err (!%p487_p8)
}
 0x4ec   :  { %s491_s26 = scalar_lea.hbm %s633_s6, 128 }
 0x4ed   :  { %p492_p9 = scmp.ne.s32.totalorder %s633_s6, %s491_s26  ;;  %p495_p10 = scmp.lt.u32.totalorder %s491_s26, %s633_s6 }
 0x4ef   :  { %p497_p11 = pnand %p495_p10, %p492_p9 }
 0x4f1   :  { %500 = shalt.err (!%p497_p11)
}
 0x4f2   :  { %323 = dma.vmem_to_hbm [thread:$0]  %s321_s22, 128, %s633_s6, [#allocation4]  }
 0x4f3   :  { %507 = dma.done.wait [#allocation4], 128  }
 0x4f4   :  { %508 = vsyncadd [#allocation4], 4294967168 }
 0x4f5   :  { %327 = vsyncpa [#allocation3], 1 }
 0x4f6   :  { %328 = vsyncpa [#allocation6], 1 }
 0x4f7   :  { %329 = vsyncpa [#allocation9], 1 }
 0x4f8   :  { %330 = vsyncpa [#allocation4], 1 }

</bundles_post_ra>
